<compile_context>
chip_gen: v6e
topology: v6e:2x2x1
jax: 0.10.0
libtpu: 0.0.40
codegen_flags: <defaults>
</compile_context>

<pallas_src>
import jax
import jax.numpy as jnp
from jax.experimental import pallas as pl
from jax.experimental.pallas import tpu as pltpu


def _round_up(x, m):
    return ((x + m - 1) // m) * m


def _custom_loss_kernel(y_pred_ref, y_true_ref, large_body_ref, out_ref):
    """Accumulate the weighted-BCE sum of one (tr, lanes) tile into a resident
    (8, lanes) f32 slab. Pure VPU work; the single cross-lane reduction and the
    mean happen once in the JAX wrapper."""
    k = pl.program_id(1)

    @pl.when(k == 0)
    def _():
        out_ref[...] = jnp.zeros_like(out_ref)

    yp = y_pred_ref[...].astype(jnp.float32)
    yt = y_true_ref[...].astype(jnp.float32)
    lb = large_body_ref[...].astype(jnp.float32)   # 0/1 int8 mask stream

    # correct*(1+large) + (1-correct)*(1+large) == 1 + large (correct in {0,1});
    # clamp(min=0.1) is then a no-op since weights >= 1. Exact.
    weights = 1.0 + lb

    # BCELoss(reduction='none'): PyTorch clamps each log term at -100.
    log_p = jnp.maximum(jnp.log(yp), -100.0)
    log_1mp = jnp.maximum(jnp.log(1.0 - yp), -100.0)
    loss = -(yt * log_p + (1.0 - yt) * log_1mp)

    prod = loss * weights                          # (tr, lanes)
    t, c = prod.shape
    # Fold row-strips elementwise into the (8, c) slab along the native 8-row
    # sublane tiling (VPU adds only, no XLU).
    out_ref[...] += prod.reshape(t // 8, 8, c).sum(axis=0)


def custom_loss(y_pred, y_true, candle_bodies, avg_body_20, *,
                lanes=512,
                max_tile_rows=8192,
                num_parallel=1,
                vmem_input_budget_bytes=24 * 1024 * 1024):
    """Weighted-BCE mean matching CustomLoss.forward(). Accepts any shapes
    (inputs are flattened); y_pred/y_true may be f32 or bf16."""
    assert lanes % 128 == 0, "lanes must be a multiple of 128 (lane-dense)"
    assert num_parallel >= 1

    n = int(y_pred.size)

    # Drop two f32 streams: compute the large-body mask upstream as int8.
    large_body = (candle_bodies > avg_body_20).astype(jnp.int8)

    yp = jnp.ravel(y_pred)
    yt = jnp.ravel(y_true)
    lb = jnp.ravel(large_body)

    # --- tile sizing -------------------------------------------------------
    # Largest row tile (multiple of 32 sublanes -> valid tiling for f32/bf16/
    # int8 packing) whose double-buffered 3-stream footprint fits the budget.
    bytes_per_row = lanes * (yp.dtype.itemsize + yt.dtype.itemsize
                             + lb.dtype.itemsize)
    budget_rows = max(32, vmem_input_budget_bytes // (2 * bytes_per_row))
    rows_min = -(-n // lanes)                      # ceil-div
    tr = min(max_tile_rows, budget_rows, _round_up(max(rows_min, 1), 32))
    tr = max(32, (tr // 32) * 32)

    # --- padding (no degenerate tile shrink) -------------------------------
    # Pad rows up to a whole number of tiles per core (< one tile of padding).
    # Pad values y_pred=1, y_true=1, mask=0 give exactly zero loss; the mean
    # denominator stays the original element count n.
    rows = _round_up(max(rows_min, 1), tr * num_parallel)
    padded = rows * lanes
    if padded != n:
        pad = padded - n
        yp = jnp.pad(yp, (0, pad), constant_values=1)
        yt = jnp.pad(yt, (0, pad), constant_values=1)
        lb = jnp.pad(lb, (0, pad), constant_values=0)
    yp = yp.reshape(rows, lanes)
    yt = yt.reshape(rows, lanes)
    lb = lb.reshape(rows, lanes)

    steps = rows // (num_parallel * tr)

    in_spec = pl.BlockSpec((tr, lanes), lambda p, k: (p * steps + k, 0))
    # One resident (8, lanes) partial-sum slab per parallel index (accumulator).
    out_spec = pl.BlockSpec((None, 8, lanes), lambda p, k: (p, 0, 0))

    if num_parallel > 1:
        # Real per-TensorCore sharding (v7x has 2 TCs per chip).
        dims = (pltpu.CORE_PARALLEL, pltpu.ARBITRARY)
    else:
        # Single-TC chips (v5e/v6e): axis 0 has extent 1, purely nominal.
        dims = ("arbitrary", "arbitrary")

    partials = pl.pallas_call(
        _custom_loss_kernel,
        out_shape=jax.ShapeDtypeStruct((num_parallel, 8, lanes), jnp.float32),
        grid_spec=pltpu.PrefetchScalarGridSpec(
            num_scalar_prefetch=0,
            grid=(num_parallel, steps),
            in_specs=[in_spec, in_spec, in_spec],
            out_specs=out_spec,
        ),
        compiler_params=pltpu.CompilerParams(
            dimension_semantics=dims,
            # Input footprint is capped at vmem_input_budget_bytes by the tile
            # sizing above; 32 MiB leaves headroom and is safe on v5e/v6e/v7x.
            vmem_limit_bytes=max(32 * 1024 * 1024,
                                 vmem_input_budget_bytes + 8 * 1024 * 1024),
        ),
    )(yp, yt, lb)

    # Single cross-lane/sublane reduction + mean, once, outside the kernel.
    return jnp.sum(partials) / float(n)


def custom_loss_ref(y_pred, y_true, candle_bodies, avg_body_20):
    # Literal transcription of the PyTorch forward (kept un-simplified).
    pred_cls = (y_pred > 0.5).astype(jnp.float32)
    correct = (pred_cls == y_true).astype(jnp.float32)
    large_body = (candle_bodies > avg_body_20).astype(jnp.float32)
    weights = correct * (1.0 + large_body) + (1.0 - correct) * (1.0 + large_body)
    weights = jnp.maximum(weights, 0.1)
    log_p = jnp.maximum(jnp.log(y_pred), -100.0)
    log_1mp = jnp.maximum(jnp.log(1.0 - y_pred), -100.0)
    loss = -(y_true * log_p + (1.0 - y_true) * log_1mp)
    return jnp.mean(loss * weights)


if __name__ == "__main__":
    key = jax.random.PRNGKey(0)

    # Ragged small shape (exercises flatten + zero-loss padding) and a
    # lane-aligned shape (exercises the no-padding streaming path).
    shapes = [(2, 4, 16), (256, 128)]
    for shape in shapes:
        k1, k2, k3, k4, key = jax.random.split(key, 5)
        y_pred = jax.nn.sigmoid(jax.random.normal(k1, shape, dtype=jnp.float32))
        y_true = jax.random.bernoulli(k2, 0.5, shape).astype(jnp.float32)
        candle_bodies = jnp.abs(jax.random.normal(k3, shape, dtype=jnp.float32))
        avg_body_20 = jnp.abs(jax.random.normal(k4, shape, dtype=jnp.float32))

        out = custom_loss(y_pred, y_true, candle_bodies, avg_body_20)
        out = jax.block_until_ready(out)

        ref = custom_loss_ref(y_pred, y_true, candle_bodies, avg_body_20)
        assert jnp.allclose(out, ref, rtol=1e-5, atol=1e-6), (shape, out, ref)

    print("KERNEL_OK")
</pallas_src>

<mosaic_0001>
module attributes {stable_mosaic.version = 11 : i64} {
  func.func @_custom_loss_kernel(%arg0: i32, %arg1: i32, %arg2: memref<32x512xf32, #tpu.memory_space<vmem>>, %arg3: memref<32x512xf32, #tpu.memory_space<vmem>>, %arg4: memref<32x512xi8, #tpu.memory_space<vmem>>, %arg5: memref<1x8x512xf32, #tpu.memory_space<vmem>>) attributes {dimension_semantics = [#tpu.dimension_semantics<arbitrary>, #tpu.dimension_semantics<arbitrary>], iteration_bounds = array<i64: 1, 1>, scalar_prefetch = 0 : i64, scratch_operands = 0 : i64, tpu.core_type = #tpu.core_type<tc>, window_params = [{transform_indices = @transform_0, window_bounds = array<i64: 32, 512>}, {transform_indices = @transform_1, window_bounds = array<i64: 32, 512>}, {transform_indices = @transform_2, window_bounds = array<i64: 32, 512>}, {transform_indices = @transform_3, window_bounds = array<i64: 1, 8, 512>}]} {
    %c0_i32 = arith.constant 0 : i32
    %0 = arith.cmpi eq, %arg1, %c0_i32 : i32
    %1 = arith.extui %0 : i1 to i32
    %c0_i32_0 = arith.constant 0 : i32
    %2 = arith.cmpi ne, %1, %c0_i32_0 : i32
    scf.if %2 {
      %cst_18 = arith.constant 0.000000e+00 : f32
      %33 = vector.broadcast %cst_18 : f32 to vector<8x512xf32>
      %c0_19 = arith.constant 0 : index
      %c0_20 = arith.constant 0 : index
      %c0_21 = arith.constant 0 : index
      %34 = vector.load %arg5[%c0_19, %c0_20, %c0_21] : memref<1x8x512xf32, #tpu.memory_space<vmem>>, vector<1x8x512xf32>
      %35 = vector.shape_cast %34 : vector<1x8x512xf32> to vector<8x512xf32>
      %36 = vector.shape_cast %33 : vector<8x512xf32> to vector<1x8x512xf32>
      tpu.vector_store %arg5[%c0_19, %c0_20, %c0_21], %36 {strides = array<i32>} : memref<1x8x512xf32, #tpu.memory_space<vmem>>, vector<1x8x512xf32>,
    } else {
    }
    %c0 = arith.constant 0 : index
    %c0_1 = arith.constant 0 : index
    %3 = vector.load %arg2[%c0, %c0_1] : memref<32x512xf32, #tpu.memory_space<vmem>>, vector<32x512xf32>
    %c0_2 = arith.constant 0 : index
    %c0_3 = arith.constant 0 : index
    %4 = vector.load %arg3[%c0_2, %c0_3] : memref<32x512xf32, #tpu.memory_space<vmem>>, vector<32x512xf32>
    %c0_4 = arith.constant 0 : index
    %c0_5 = arith.constant 0 : index
    %5 = vector.load %arg4[%c0_4, %c0_5] : memref<32x512xi8, #tpu.memory_space<vmem>>, vector<32x512xi8>
    %6 = arith.sitofp %5 : vector<32x512xi8> to vector<32x512xf32>
    %cst = arith.constant 1.000000e+00 : f32
    %7 = vector.broadcast %cst : f32 to vector<32x512xf32>
    %8 = arith.addf %7, %6 : vector<32x512xf32>
    %9 = math.log %3 : vector<32x512xf32>
    %cst_6 = arith.constant -1.000000e+02 : f32
    %10 = vector.broadcast %cst_6 : f32 to vector<32x512xf32>
    %11 = arith.maximumf %9, %10 : vector<32x512xf32>
    %cst_7 = arith.constant 1.000000e+00 : f32
    %12 = vector.broadcast %cst_7 : f32 to vector<32x512xf32>
    %13 = arith.subf %12, %3 : vector<32x512xf32>
    %14 = math.log %13 : vector<32x512xf32>
    %cst_8 = arith.constant -1.000000e+02 : f32
    %15 = vector.broadcast %cst_8 : f32 to vector<32x512xf32>
    %16 = arith.maximumf %14, %15 : vector<32x512xf32>
    %17 = arith.mulf %4, %11 : vector<32x512xf32>
    %cst_9 = arith.constant 1.000000e+00 : f32
    %18 = vector.broadcast %cst_9 : f32 to vector<32x512xf32>
    %19 = arith.subf %18, %4 : vector<32x512xf32>
    %20 = arith.mulf %19, %16 : vector<32x512xf32>
    %21 = arith.addf %17, %20 : vector<32x512xf32>
    %cst_10 = arith.constant 0.000000e+00 : f32
    %22 = vector.broadcast %cst_10 : f32 to vector<32x512xf32>
    %23 = arith.subf %22, %21 : vector<32x512xf32>
    %24 = arith.mulf %23, %8 : vector<32x512xf32>
    %c0_11 = arith.constant 0 : index
    %c0_12 = arith.constant 0 : index
    %c0_13 = arith.constant 0 : index
    %25 = vector.load %arg5[%c0_11, %c0_12, %c0_13] : memref<1x8x512xf32, #tpu.memory_space<vmem>>, vector<1x8x512xf32>
    %26 = vector.shape_cast %25 : vector<1x8x512xf32> to vector<8x512xf32>
    %27 = vector.shape_cast %24 : vector<32x512xf32> to vector<4x8x512xf32>
    %cst_14 = arith.constant dense<0.000000e+00> : vector<8x512xf32>
    %28 = vector.multi_reduction <add>, %27, %cst_14 [0] : vector<4x8x512xf32> to vector<8x512xf32>
    %29 = arith.addf %26, %28 : vector<8x512xf32>
    %c0_15 = arith.constant 0 : index
    %c0_16 = arith.constant 0 : index
    %c0_17 = arith.constant 0 : index
    %30 = vector.load %arg5[%c0_15, %c0_16, %c0_17] : memref<1x8x512xf32, #tpu.memory_space<vmem>>, vector<1x8x512xf32>
    %31 = vector.shape_cast %30 : vector<1x8x512xf32> to vector<8x512xf32>
    %32 = vector.shape_cast %29 : vector<8x512xf32> to vector<1x8x512xf32>
    tpu.vector_store %arg5[%c0_15, %c0_16, %c0_17], %32 {strides = array<i32>} : memref<1x8x512xf32, #tpu.memory_space<vmem>>, vector<1x8x512xf32>,
    return
  }
  func.func @transform_0(%arg0: i32, %arg1: i32) -> (i32, i32) {
    %c1_i32 = arith.constant 1 : i32
    %0 = arith.muli %arg0, %c1_i32 : i32
    %1 = arith.addi %0, %arg1 : i32
    %c0_i32 = arith.constant 0 : i32
    %c0_i32_0 = arith.constant 0 : i32
    return %1, %c0_i32 : i32, i32
  }
  func.func @transform_1(%arg0: i32, %arg1: i32) -> (i32, i32) {
    %c1_i32 = arith.constant 1 : i32
    %0 = arith.muli %arg0, %c1_i32 : i32
    %1 = arith.addi %0, %arg1 : i32
    %c0_i32 = arith.constant 0 : i32
    %c0_i32_0 = arith.constant 0 : i32
    return %1, %c0_i32 : i32, i32
  }
  func.func @transform_2(%arg0: i32, %arg1: i32) -> (i32, i32) {
    %c1_i32 = arith.constant 1 : i32
    %0 = arith.muli %arg0, %c1_i32 : i32
    %1 = arith.addi %0, %arg1 : i32
    %c0_i32 = arith.constant 0 : i32
    %c0_i32_0 = arith.constant 0 : i32
    return %1, %c0_i32 : i32, i32
  }
  func.func @transform_3(%arg0: i32, %arg1: i32) -> (i32, i32, i32) {
    %c0_i32 = arith.constant 0 : i32
    %c0_i32_0 = arith.constant 0 : i32
    %c0_i32_1 = arith.constant 0 : i32
    return %arg0, %c0_i32, %c0_i32_0 : i32, i32, i32
  }
}

</mosaic_0001>

<bundles_post_ra>
// kernel: tpu_custom_call.1
= control target key start
LH: loop header
LB: loop body
LE: loop exit
PB: predicated region body
PF: predicated region fallthrough
CT: control target
= control target key end

     0   :  { %8 = vsyncpa [#allocation3], 0  ;;  %s721_s0 = inlined_call_operand.hbm [shape: f32[32,512], index: 0, kind: input, shape index: {}]   ;;  %s722_s1 = inlined_call_operand.hbm [shape: f32[32,512], index: 1, kind: input, shape index: {}]   ;;  %s723_s2 = inlined_call_operand.hbm [shape: s8[32,512], index: 2, kind: input, shape index: {}]   ;;  %s724_s3 = inlined_call_operand.hbm [shape: f32[1,8,512], index: 3, kind: output, shape index: {}]  }
   0x1   :  { %9 = vsyncpa [#allocation6], 0 }
   0x2   :  { %10 = vsyncpa [#allocation4], 0  ;;  %s570_s12 = smov [#allocation5]   ;;  %s571_s14 = smov [#allocation2]  }
   0x3   :  { %s38_s13 = sshll.u32 %s570_s12, 4  ;;  %s21_s15 = sshll.u32 %s571_s14, 4  ;;  %s39_s13 = int_to_ptr.vmem [resolvable:$true] %s38_s13  ;;  %s22_s15 = int_to_ptr.vmem [resolvable:$true] %s21_s15 }
   0x4   :  { %s492_s16 = scalar_lea.vmem %s39_s13, 2048  ;;  %p497_p1 = scmp.lt.s32.totalorder %s39_s13, %s39_s13 }
   0x5   :  { %p493_p0 = scmp.ne.s32.totalorder %s39_s13, %s492_s16  ;;  %p498_p2 = scmp.lt.s32.totalorder %s492_s16, %s492_s16 }
   0x7   :  { %p499_p3 = por %p498_p2, %p497_p1 }
   0x9   :  { %p500_p4 = pnand %p499_p3, %p493_p0 }
   0xb   :  { %503 = shalt.err (!%p500_p4)
}
   0xc   :  { %s572_s17 = smov 512   ;;  %s573_s18 = smov 32  }
   0xd   :  { %44 = dma.hbm_to_vmem [thread:$0]  %s722_s1, 2048, %s39_s13, [#allocation6], %s572_s17, %s572_s17, %s573_s18  }
   0xe   :  { %s512_s21 = scalar_lea.vmem %s22_s15, 2048  ;;  %p517_p6 = scmp.lt.s32.totalorder %s22_s15, %s22_s15 }
   0xf   :  { %p513_p5 = scmp.ne.s32.totalorder %s22_s15, %s512_s21  ;;  %p518_p7 = scmp.lt.s32.totalorder %s512_s21, %s512_s21 }
  0x11   :  { %p519_p8 = por %p518_p7, %p517_p6 }
  0x13   :  { %p520_p9 = pnand %p519_p8, %p513_p5 }
  0x15   :  { %523 = shalt.err (!%p520_p9)
}
  0x16   :  { %27 = dma.hbm_to_vmem [thread:$0]  %s721_s0, 2048, %s22_s15, [#allocation3], %s572_s17, %s572_s17, %s573_s18  }
  0x17   :  { %s574_s24 = smov [#allocation7]  }
  0x18   :  { %s55_s25 = sshll.u32 %s574_s24, 4  ;;  %s56_s25 = int_to_ptr.vmem [resolvable:$true] %s55_s25 }
  0x19   :  { %s532_s26 = scalar_lea.vmem %s56_s25, 512  ;;  %p537_p11 = scmp.lt.s32.totalorder %s56_s25, %s56_s25 }
  0x1a   :  { %p533_p10 = scmp.ne.s32.totalorder %s56_s25, %s532_s26  ;;  %p538_p12 = scmp.lt.s32.totalorder %s532_s26, %s532_s26 }
  0x1c   :  { %p539_p13 = por %p538_p12, %p537_p11 }
  0x1e   :  { %p540_p0 = pnand %p539_p13, %p533_p10 }
  0x20   :  { %543 = shalt.err (!%p540_p0)
}
  0x21   :  { %58 = dma.hbm_to_vmem [thread:$0]  %s723_s2, 512, %s56_s25, [#allocation6]  }
  0x22   :  { %564 = dma.done.wait [#allocation3], 2048  }
  0x23   :  { %565 = vsyncadd [#allocation3], 4294965248 }
  0x24   :  { %566 = dma.done.wait [#allocation6], 2560  }
  0x25   :  { %567 = vsyncadd [#allocation6], 4294964736  ;;  %v81_v0 = vld [vmem:[#allocation2] sm:$0xff]  ;;  %v114_v21 = vld [vmem:[#allocation7 + $0x8] sm:$0xff]  ;;  %s575_s0 = smov [#allocation8]  }
  0x26   :  { %v85_v1 = vld [vmem:[#allocation2 + $0x20] sm:$0xff]  ;;  %420 = vlog2.f32 %v81_v0  ;;  %v213_v6 = vsub.f32 1.0, %v81_v0  ;;  %v82_v22 = vld [vmem:[#allocation2 + $0x8] sm:$0xff]  ;;  %v118_v23 = vunpack.c.0.s8 %v114_v21  ;;  %v122_v24 = vunpack.c.1.s8 %v114_v21  ;;  %v625_v43 = vld [vmem:[#allocation7 + $0x10] sm:$0xff]  ;;  %s403_s2 = sshll.u32 %s575_s0, 4  ;;  %s404_s2 = int_to_ptr.vmem [resolvable:$true] %s403_s2 }
  0x27   :  { %v89_v2 = vld [vmem:[#allocation2 + $0x40] sm:$0xff]  ;;  %422 = vlog2.f32 %v85_v1  ;;  %v217_v14 = vsub.f32 1.0, %v85_v1  ;;  %v126_v25 = vunpack.c.2.s8 %v114_v21  ;;  %v86_v30 = vld [vmem:[#allocation2 + $0x28] sm:$0xff]  ;;  %v130_v32 = vunpack.c.3.s8 %v114_v21  ;;  %v83_v59 = vld [vmem:[#allocation2 + $0x10] sm:$0xff]  ;;  %s544_s28 = scalar_lea.vmem %s404_s2, 512  ;;  %p549_p2 = scmp.lt.s32.totalorder %s404_s2, %s404_s2 }
  0x28   :  { %v93_v3 = vld [vmem:[#allocation2 + $0x60] sm:$0xff]  ;;  %424 = vlog2.f32 %v89_v2  ;;  %v221_v15 = vsub.f32 1.0, %v89_v2  ;;  %v90_v31 = vld [vmem:[#allocation2 + $0x48] sm:$0xff]  ;;  %v134_v33 = vcvt.s32.f32 %v118_v23  ;;  %v138_v34 = vcvt.s32.f32 %v122_v24  ;;  %p545_p1 = scmp.ne.s32.totalorder %s404_s2, %s544_s28  ;;  %p550_p3 = scmp.lt.s32.totalorder %s544_s28, %s544_s28 }
  0x29   :  { %v605_v4 = vld [vmem:[#allocation5] sm:$0xff]  ;;  %v225_v16 = vsub.f32 1.0, %v93_v3  ;;  %426 = vlog2.f32 %v93_v3  ;;  %v142_v36 = vcvt.s32.f32 %v126_v25  ;;  %v214_v37 = vsub.f32 1.0, %v82_v22  ;;  %v94_v40 = vld [vmem:[#allocation2 + $0x68] sm:$0xff]  ;;  %v87_v3 = vld [vmem:[#allocation2 + $0x30] sm:$0xff] }
  0x2a   :  { %v113_v5 = vld [vmem:[#allocation7] sm:$0xff]  ;;  %v293_v20 = vsub.f32 1.0, %v605_v4  ;;  %428 = vlog2.f32 %v213_v6  ;;  %v623_v41 = vld [vmem:[#allocation5 + $0x8] sm:$0xff]  ;;  %v146_v42 = vcvt.s32.f32 %v130_v32  ;;  %v218_v46 = vsub.f32 1.0, %v86_v30  ;;  %p551_p4 = por %p550_p3, %p549_p2 }
  0x2b   :  { %v117_v7 = vunpack.c.0.s8 %v113_v5  ;;  %v121_v8 = vunpack.c.1.s8 %v113_v5  ;;  %v125_v9 = vunpack.c.2.s8 %v113_v5  ;;  %v129_v10 = vunpack.c.3.s8 %v113_v5  ;;  %v607_v11 = vld [vmem:[#allocation5 + $0x20] sm:$0xff]  ;;  %v629_v45 = vld [vmem:[#allocation5 + $0x28] sm:$0xff] }
  0x2c   :  { %v609_v12 = vld [vmem:[#allocation5 + $0x40] sm:$0xff]  ;;  %v297_v27 = vsub.f32 1.0, %v607_v11  ;;  %430 = vlog2.f32 %v217_v14  ;;  %v222_v47 = vsub.f32 1.0, %v90_v31  ;;  %v631_v48 = vld [vmem:[#allocation5 + $0x48] sm:$0xff]  ;;  %v633_v49 = vadd.f32 1.0, %v134_v33  ;;  %p552_p5 = pnand %p551_p4, %p545_p1 }
  0x2d   :  { %v611_v13 = vld [vmem:[#allocation5 + $0x60] sm:$0xff]  ;;  %v133_v17 = vcvt.s32.f32 %v117_v7  ;;  %v137_v18 = vcvt.s32.f32 %v121_v8  ;;  %v141_v19 = vcvt.s32.f32 %v125_v9  ;;  %v145_v26 = vcvt.s32.f32 %v129_v10  ;;  %v639_v52 = vld [vmem:[#allocation5 + $0x68] sm:$0xff] }
  0x2e   :  { %v301_v28 = vsub.f32 1.0, %v609_v12  ;;  %v305_v29 = vsub.f32 1.0, %v611_v13  ;;  %432 = vlog2.f32 %v221_v15  ;;  %v635_v50 = vadd.f32 1.0, %v138_v34  ;;  %v91_v15 = vld [vmem:[#allocation2 + $0x50] sm:$0xff] }
  0x2f   :  { %v617_v35 = vadd.f32 1.0, %v133_v17  ;;  %v619_v38 = vadd.f32 1.0, %v137_v18  ;;  %v621_v39 = vadd.f32 1.0, %v141_v19  ;;  %v627_v44 = vadd.f32 1.0, %v145_v26  ;;  %v653_v17 = vld [vmem:[#allocation5 + $0x10] sm:$0xff] }
  0x30   :  { %434 = vlog2.f32 %v225_v16  ;;  %v637_v51 = vadd.f32 1.0, %v142_v36  ;;  %v226_v53 = vsub.f32 1.0, %v94_v40  ;;  %v294_v54 = vsub.f32 1.0, %v623_v41  ;;  %v95_v16 = vld [vmem:[#allocation2 + $0x70] sm:$0xff] }
  0x31   :  { %436 = vlog2.f32 %v82_v22  ;;  %v119_v55 = vunpack.c.0.s8 %v625_v43  ;;  %v643_v57 = vadd.f32 1.0, %v146_v42  ;;  %v298_v58 = vsub.f32 1.0, %v629_v45 }
  0x32   :  { %438 = vlog2.f32 %v86_v30  ;;  %v123_v60 = vunpack.c.1.s8 %v625_v43  ;;  %v302_v63 = vsub.f32 1.0, %v631_v48  ;;  %v127_v0 = vunpack.c.2.s8 %v625_v43  ;;  %v661_v30 = vld [vmem:[#allocation5 + $0x30] sm:$0xff] }
  0x33   :  { %v421_v56 = vpop.eup %420  ;;  %440 = vlog2.f32 %v90_v31  ;;  %v306_v2 = vsub.f32 1.0, %v639_v52  ;;  %v131_v5 = vunpack.c.3.s8 %v625_v43  ;;  %v651_v8 = vcvt.s32.f32 %v119_v55  ;;  %v663_v31 = vld [vmem:[#allocation5 + $0x50] sm:$0xff] }
  0x34   :  { %v423_v61 = vpop.eup %422  ;;  %v166_v62 = vmul.f32 0.6931472, %v421_v56  ;;  %442 = vlog2.f32 %v94_v40  ;;  %v215_v9 = vsub.f32 1.0, %v83_v59  ;;  %v655_v18 = vcvt.s32.f32 %v123_v60 }
  0x35   :  { %v174_v1 = vmul.f32 0.6931472, %v423_v61  ;;  %444 = vlog2.f32 %v214_v37  ;;  %v425_v6 = vpop.eup %424  ;;  %v658_v22 = vcvt.s32.f32 %v127_v0  ;;  %v219_v23 = vsub.f32 1.0, %v87_v3 }
  0x36   :  { %v197_v7 = vmax.f32 %v166_v62, -100.0  ;;  %446 = vlog2.f32 %v218_v46  ;;  %v182_v10 = vmul.f32 0.6931472, %v425_v6  ;;  %v427_v19 = vpop.eup %426  ;;  %v223_v33 = vsub.f32 1.0, %v91_v15 }
  0x37   :  { %v201_v14 = vmax.f32 %v174_v1, -100.0  ;;  %448 = vlog2.f32 %v222_v47  ;;  %v190_v24 = vmul.f32 0.6931472, %v427_v19  ;;  %v429_v32 = vpop.eup %428  ;;  %v227_v34 = vsub.f32 1.0, %v95_v16  ;;  %v667_v47 = vld [vmem:[#allocation5 + $0x70] sm:$0xff] }
  0x38   :  { %v277_v21 = vmul.f32 %v197_v7, %v605_v4  ;;  %450 = vlog2.f32 %v226_v53  ;;  %v205_v25 = vmax.f32 %v182_v10, -100.0  ;;  %v295_v36 = vsub.f32 1.0, %v653_v17 }
  0x39   :  { %v281_v26 = vmul.f32 %v201_v14, %v607_v11  ;;  %452 = vlog2.f32 %v83_v59  ;;  %v431_v37 = vpop.eup %430  ;;  %v209_v40 = vmax.f32 %v190_v24, -100.0  ;;  %v230_v42 = vmul.f32 0.6931472, %v429_v32 }
  0x3a   :  { %454 = vlog2.f32 %v87_v3  ;;  %v285_v46 = vmul.f32 %v205_v25, %v609_v12  ;;  %v238_v55 = vmul.f32 0.6931472, %v431_v37  ;;  %v299_v56 = vsub.f32 1.0, %v661_v30 }
  0x3b   :  { %456 = vlog2.f32 %v91_v15  ;;  %v433_v53 = vpop.eup %432  ;;  %v303_v59 = vsub.f32 1.0, %v663_v31  ;;  %v261_v62 = vmax.f32 %v230_v42, -100.0  ;;  %v289_v0 = vmul.f32 %v209_v40, %v611_v13 }
  0x3c   :  { %458 = vlog2.f32 %v95_v16  ;;  %v246_v61 = vmul.f32 0.6931472, %v433_v53  ;;  %v265_v6 = vmax.f32 %v238_v55, -100.0  ;;  %v307_v7 = vsub.f32 1.0, %v667_v47 }
  0x3d   :  { %v435_v60 = vpop.eup %434  ;;  %460 = vlog2.f32 %v215_v9  ;;  %v309_v15 = vmul.f32 %v293_v20, %v261_v62 }
  0x3e   :  { %v437_v1 = vpop.eup %436  ;;  %v254_v3 = vmul.f32 0.6931472, %v435_v60  ;;  %462 = vlog2.f32 %v219_v23  ;;  %v269_v14 = vmax.f32 %v246_v61, -100.0  ;;  %v313_v25 = vmul.f32 %v297_v27, %v265_v6 }
  0x3f   :  { %v439_v10 = vpop.eup %438  ;;  %v168_v16 = vmul.f32 0.6931472, %v437_v1  ;;  %464 = vlog2.f32 %v223_v33  ;;  %v325_v37 = vadd.f32 %v309_v15, %v277_v21 }
  0x40   :  { %v441_v19 = vpop.eup %440  ;;  %v273_v24 = vmax.f32 %v254_v3, -100.0  ;;  %v176_v32 = vmul.f32 0.6931472, %v439_v10  ;;  %466 = vlog2.f32 %v227_v34  ;;  %v317_v23 = vmul.f32 %v301_v28, %v269_v14 }
  0x41   :  { %v443_v9 = vpop.eup %442  ;;  %v184_v40 = vmul.f32 0.6931472, %v441_v19  ;;  %v198_v42 = vmax.f32 %v168_v16, -100.0  ;;  %v329_v20 = vadd.f32 %v313_v25, %v281_v26  ;;  %v341_v11 = vsub.f32 0.0, %v325_v37 }
  0x42   :  { %v445_v53 = vpop.eup %444  ;;  %v321_v4 = vmul.f32 %v305_v29, %v273_v24  ;;  %v192_v33 = vmul.f32 0.6931472, %v443_v9  ;;  %v202_v55 = vmax.f32 %v176_v32, -100.0  ;;  %v333_v61 = vadd.f32 %v317_v23, %v285_v46 }
  0x43   :  { %v447_v60 = vpop.eup %446  ;;  %v206_v27 = vmax.f32 %v184_v40, -100.0  ;;  %v232_v62 = vmul.f32 0.6931472, %v445_v53  ;;  %v345_v3 = vsub.f32 0.0, %v329_v20  ;;  %v357_v10 = vmul.f32 %v341_v11, %v617_v35 }
  0x44   :  { %v449_v34 = vpop.eup %448  ;;  %v337_v1 = vadd.f32 %v321_v4, %v289_v0  ;;  %v210_v12 = vmax.f32 %v192_v33, -100.0  ;;  %v240_v28 = vmul.f32 0.6931472, %v447_v60  ;;  %v349_v6 = vsub.f32 0.0, %v333_v61 }
  0x45   :  { %v451_v21 = vpop.eup %450  ;;  %v248_v14 = vmul.f32 0.6931472, %v449_v34  ;;  %v262_v13 = vmax.f32 %v232_v62, -100.0  ;;  %v361_v15 = vmul.f32 %v345_v3, %v619_v38  ;;  %v278_v0 = vmul.f32 %v198_v42, %v623_v41 }
  0x46   :  { %v453_v29 = vpop.eup %452  ;;  %v353_v26 = vsub.f32 0.0, %v337_v1  ;;  %v256_v16 = vmul.f32 0.6931472, %v451_v21  ;;  %v266_v46 = vmax.f32 %v240_v28, -100.0  ;;  %v365_v24 = vmul.f32 %v349_v6, %v621_v39 }
  0x47   :  { %v455_v19 = vpop.eup %454  ;;  %v270_v25 = vmax.f32 %v248_v14, -100.0  ;;  %v282_v32 = vmul.f32 %v202_v55, %v629_v45  ;;  %v377_v35 = vadd.f32 %v361_v15, %v357_v10  ;;  %v286_v40 = vmul.f32 %v206_v27, %v631_v48 }
  0x48   :  { %v457_v9 = vpop.eup %456  ;;  %v369_v23 = vmul.f32 %v353_v26, %v627_v44  ;;  %v274_v37 = vmax.f32 %v256_v16, -100.0  ;;  %v290_v38 = vmul.f32 %v210_v12, %v639_v52  ;;  %v310_v4 = vmul.f32 %v294_v54, %v262_v13 }
  0x49   :  { %v459_v53 = vpop.eup %458  ;;  %v314_v39 = vmul.f32 %v298_v58, %v266_v46  ;;  %v318_v42 = vmul.f32 %v302_v63, %v270_v25  ;;  %v378_v33 = vadd.f32 %v377_v35, %v365_v24  ;;  %v170_v55 = vmul.f32 0.6931472, %v453_v29 }
  0x4a   :  { %v461_v20 = vpop.eup %460  ;;  %v322_v44 = vmul.f32 %v306_v2, %v274_v37  ;;  %v178_v60 = vmul.f32 0.6931472, %v455_v19  ;;  %v326_v11 = vadd.f32 %v310_v4, %v278_v0  ;;  %v186_v34 = vmul.f32 0.6931472, %v457_v9 }
  0x4b   :  { %v463_v61 = vpop.eup %462  ;;  %v330_v27 = vadd.f32 %v314_v39, %v282_v32  ;;  %v334_v62 = vadd.f32 %v318_v42, %v286_v40  ;;  %v379_v54 = vadd.f32 %v378_v33, %v369_v23  ;;  %v194_v45 = vmul.f32 0.6931472, %v459_v53 }
  0x4c   :  { %v465_v41 = vpop.eup %464  ;;  %v338_v1 = vadd.f32 %v322_v44, %v290_v38  ;;  %v199_v58 = vmax.f32 %v170_v55, -100.0  ;;  %v342_v48 = vsub.f32 0.0, %v326_v11  ;;  %v203_v28 = vmax.f32 %v178_v60, -100.0  ;;  %v96_v55 = vld [vmem:[#allocation2 + $0x78] sm:$0xff] }
  0x4d   :  { %v467_v3 = vpop.eup %466  ;;  %v346_v63 = vsub.f32 0.0, %v330_v27  ;;  %v350_v12 = vsub.f32 0.0, %v334_v62  ;;  %v207_v52 = vmax.f32 %v186_v34, -100.0  ;;  %v211_v2 = vmax.f32 %v194_v45, -100.0  ;;  %393 = vst [vmem:[#allocation8] sm:$0xff] %v379_v54 }
  0x4e   :  { %v354_v21 = vsub.f32 0.0, %v338_v1  ;;  %v358_v6 = vmul.f32 %v342_v48, %v633_v49  ;;  %v234_v13 = vmul.f32 0.6931472, %v461_v20  ;;  %v242_v26 = vmul.f32 0.6931472, %v463_v61  ;;  %v100_v48 = vld [vmem:[#allocation5 + $0x18] sm:$0xff] }
  0x4f   :  { %v362_v10 = vmul.f32 %v346_v63, %v635_v50  ;;  %v366_v14 = vmul.f32 %v350_v12, %v637_v51  ;;  %v250_v15 = vmul.f32 0.6931472, %v465_v41  ;;  %v258_v16 = vmul.f32 0.6931472, %v467_v3  ;;  %v116_v41 = vld [vmem:[#allocation7 + $0x18] sm:$0xff] }
  0x50   :  { %v370_v29 = vmul.f32 %v354_v21, %v643_v57  ;;  %v263_v19 = vmax.f32 %v234_v13, -100.0  ;;  %v279_v24 = vmul.f32 %v199_v58, %v653_v17  ;;  %v283_v25 = vmul.f32 %v203_v28, %v661_v30  ;;  %v104_v21 = vld [vmem:[#allocation5 + $0x38] sm:$0xff] }
  0x51   :  { %v380_v46 = vadd.f32 %v362_v10, %v358_v6  ;;  %v267_v0 = vmax.f32 %v242_v26, -100.0  ;;  %v271_v32 = vmax.f32 %v250_v15, -100.0  ;;  %v275_v49 = vmax.f32 %v258_v16, -100.0  ;;  %v108_v10 = vld [vmem:[#allocation5 + $0x58] sm:$0xff] }
  0x52   :  { %v287_v50 = vmul.f32 %v207_v52, %v663_v31  ;;  %v291_v51 = vmul.f32 %v211_v2, %v667_v47  ;;  %v311_v57 = vmul.f32 %v295_v36, %v263_v19  ;;  %v147_v23 = vcvt.s32.f32 %v131_v5  ;;  %v112_v16 = vld [vmem:[#allocation5 + $0x78] sm:$0xff] }
  0x53   :  { %v381_v9 = vadd.f32 %v380_v46, %v366_v14  ;;  %v315_v35 = vmul.f32 %v299_v56, %v267_v0  ;;  %v319_v37 = vmul.f32 %v303_v59, %v271_v32  ;;  %v323_v40 = vmul.f32 %v307_v7, %v275_v49  ;;  %v84_v59 = vld [vmem:[#allocation2 + $0x18] sm:$0xff] }
  0x54   :  { %v151_v38 = vadd.f32 1.0, %v651_v8  ;;  %v155_v4 = vadd.f32 1.0, %v655_v18  ;;  %v327_v39 = vadd.f32 %v311_v57, %v279_v24  ;;  %v159_v17 = vadd.f32 1.0, %v658_v22  ;;  %v88_v7 = vld [vmem:[#allocation2 + $0x38] sm:$0xff] }
  0x55   :  { %v382_v53 = vadd.f32 %v381_v9, %v370_v29  ;;  %v331_v36 = vadd.f32 %v315_v35, %v283_v25  ;;  %v335_v43 = vadd.f32 %v319_v37, %v287_v50  ;;  %v339_v5 = vadd.f32 %v323_v40, %v291_v51  ;;  %v92_v8 = vld [vmem:[#allocation2 + $0x58] sm:$0xff] }
  0x56   :  { %v343_v42 = vsub.f32 0.0, %v327_v39  ;;  %v163_v30 = vadd.f32 1.0, %v147_v23  ;;  %468 = vlog2.f32 %v84_v59  ;;  %v216_v18 = vsub.f32 1.0, %v84_v59 }
  0x57   :  { %v347_v56 = vsub.f32 0.0, %v331_v36  ;;  %v351_v20 = vsub.f32 0.0, %v335_v43  ;;  %v355_v31 = vsub.f32 0.0, %v339_v5  ;;  %394 = vst [vmem:[#allocation8 + $0x8] sm:$0xff] %v382_v53  ;;  %470 = vlog2.f32 %v88_v7 }
  0x58   :  { %v359_v47 = vmul.f32 %v343_v42, %v151_v38  ;;  %v220_v61 = vsub.f32 1.0, %v88_v7  ;;  %472 = vlog2.f32 %v92_v8  ;;  %v224_v11 = vsub.f32 1.0, %v92_v8 }
  0x59   :  { %v363_v33 = vmul.f32 %v347_v56, %v155_v4  ;;  %v367_v44 = vmul.f32 %v351_v20, %v159_v17  ;;  %v371_v60 = vmul.f32 %v355_v31, %v163_v30  ;;  %474 = vlog2.f32 %v96_v55 }
  0x5a   :  { %v228_v62 = vsub.f32 1.0, %v96_v55  ;;  %476 = vlog2.f32 %v216_v18  ;;  %v120_v45 = vunpack.c.0.s8 %v116_v41  ;;  %v124_v63 = vunpack.c.1.s8 %v116_v41 }
  0x5b   :  { %v383_v22 = vadd.f32 %v363_v33, %v359_v47  ;;  %478 = vlog2.f32 %v220_v61  ;;  %v128_v14 = vunpack.c.2.s8 %v116_v41  ;;  %v132_v13 = vunpack.c.3.s8 %v116_v41 }
  0x5c   :  { %480 = vlog2.f32 %v224_v11  ;;  %v136_v46 = vcvt.s32.f32 %v120_v45  ;;  %v296_v25 = vsub.f32 1.0, %v100_v48  ;;  %v140_v32 = vcvt.s32.f32 %v124_v63 }
  0x5d   :  { %v384_v27 = vadd.f32 %v383_v22, %v367_v44  ;;  %482 = vlog2.f32 %v228_v62  ;;  %v300_v9 = vsub.f32 1.0, %v104_v21  ;;  %v304_v37 = vsub.f32 1.0, %v108_v10 }
  0x5e   :  { %v308_v4 = vsub.f32 1.0, %v112_v16  ;;  %v144_v39 = vcvt.s32.f32 %v128_v14  ;;  %v148_v5 = vcvt.s32.f32 %v132_v13  ;;  %v152_v20 = vadd.f32 1.0, %v136_v46 }
  0x5f   :  { %v385_v34 = vadd.f32 %v384_v27, %v371_v60  ;;  %v156_v47 = vadd.f32 1.0, %v140_v32 }
  0x60   :  { %v160_v44 = vadd.f32 1.0, %v144_v39  ;;  %v164_v18 = vadd.f32 1.0, %v148_v5 }
  0x61   :  { %395 = vst [vmem:[#allocation8 + $0x10] sm:$0xff] %v385_v34 }
  0x63   :  { %v469_v54 = vpop.eup %468 }
  0x64   :  { %v471_v1 = vpop.eup %470  ;;  %v172_v58 = vmul.f32 0.6931472, %v469_v54 }
  0x65   :  { %v473_v3 = vpop.eup %472  ;;  %v180_v12 = vmul.f32 0.6931472, %v471_v1 }
  0x66   :  { %v475_v28 = vpop.eup %474  ;;  %v188_v52 = vmul.f32 0.6931472, %v473_v3  ;;  %v200_v2 = vmax.f32 %v172_v58, -100.0 }
  0x67   :  { %v477_v6 = vpop.eup %476  ;;  %v196_v29 = vmul.f32 0.6931472, %v475_v28  ;;  %v204_v26 = vmax.f32 %v180_v12, -100.0 }
  0x68   :  { %v479_v15 = vpop.eup %478  ;;  %v208_v19 = vmax.f32 %v188_v52, -100.0  ;;  %v236_v24 = vmul.f32 0.6931472, %v477_v6  ;;  %v280_v35 = vmul.f32 %v200_v2, %v100_v48 }
  0x69   :  { %v481_v0 = vpop.eup %480  ;;  %v212_v49 = vmax.f32 %v196_v29, -100.0  ;;  %v244_v50 = vmul.f32 0.6931472, %v479_v15  ;;  %v284_v38 = vmul.f32 %v204_v26, %v104_v21 }
  0x6a   :  { %v483_v51 = vpop.eup %482  ;;  %v252_v57 = vmul.f32 0.6931472, %v481_v0  ;;  %v264_v23 = vmax.f32 %v236_v24, -100.0  ;;  %v288_v36 = vmul.f32 %v208_v19, %v108_v10 }
  0x6b   :  { %v260_v40 = vmul.f32 0.6931472, %v483_v51  ;;  %v268_v53 = vmax.f32 %v244_v50, -100.0  ;;  %v292_v30 = vmul.f32 %v212_v49, %v112_v16 }
  0x6c   :  { %v272_v17 = vmax.f32 %v252_v57, -100.0  ;;  %v312_v43 = vmul.f32 %v296_v25, %v264_v23 }
  0x6d   :  { %v276_v42 = vmax.f32 %v260_v40, -100.0  ;;  %v316_v56 = vmul.f32 %v300_v9, %v268_v53 }
  0x6e   :  { %v320_v31 = vmul.f32 %v304_v37, %v272_v17  ;;  %v328_v59 = vadd.f32 %v312_v43, %v280_v35 }
  0x6f   :  { %v324_v7 = vmul.f32 %v308_v4, %v276_v42  ;;  %v332_v33 = vadd.f32 %v316_v56, %v284_v38 }
  0x70   :  { %v336_v8 = vadd.f32 %v320_v31, %v288_v36  ;;  %v344_v55 = vsub.f32 0.0, %v328_v59 }
  0x71   :  { %v340_v60 = vadd.f32 %v324_v7, %v292_v30  ;;  %v348_v22 = vsub.f32 0.0, %v332_v33 }
  0x72   :  { %v352_v61 = vsub.f32 0.0, %v336_v8  ;;  %v360_v11 = vmul.f32 %v344_v55, %v152_v20 }
  0x73   :  { %v356_v27 = vsub.f32 0.0, %v340_v60  ;;  %v364_v62 = vmul.f32 %v348_v22, %v156_v47 }
  0x74   :  { %v368_v34 = vmul.f32 %v352_v61, %v160_v44 }
  0x75   :  { %v372_v41 = vmul.f32 %v356_v27, %v164_v18  ;;  %v386_v54 = vadd.f32 %v364_v62, %v360_v11 }
  0x77   :  { %v387_v1 = vadd.f32 %v386_v54, %v368_v34 }
  0x79   :  { %v388_v45 = vadd.f32 %v387_v1, %v372_v41 }
  0x7b   :  { %396 = vst [vmem:[#allocation8 + $0x18] sm:$0xff] %v388_v45 }
  0x7c   :  { %555 = shalt.err (!%p552_p5)
}
  0x7d   :  { %406 = dma.vmem_to_hbm [thread:$0]  %s404_s2, 512, %s724_s3, [#allocation4]  }
  0x7e   :  { %568 = dma.done.wait [#allocation4], 512  }
  0x7f   :  { %569 = vsyncadd [#allocation4], 4294966784 }
  0x80   :  { %410 = vsyncpa [#allocation3], 1 }
  0x81   :  { %411 = vsyncpa [#allocation6], 1 }
  0x82   :  { %412 = vsyncpa [#allocation4], 1 }

</bundles_post_ra>
